<compile_context>
chip_gen: v6e
topology: v6e:2x2x1
jax: 0.10.0
libtpu: 0.0.40
codegen_flags: <defaults>
</compile_context>

<pallas_src>
import jax
import jax.numpy as jnp
from jax import lax
from jax.experimental import pallas as pl
from jax.experimental.pallas import tpu as pltpu


def discriminator_kernel(xt_ref, w1_ref, b1_ref, w2_ref, b2_ref, w3t_ref,
                         b3_ref, out_ref):
    xt = xt_ref[...]                           # (input_size, TILE_N)
    in_size = xt.shape[0]
    out_size = out_ref.shape[0]

    # ---- Layer 1: Linear + ReLU  (W1 @ x_T + b1) ----
    if in_size == 1:
        # K == 1: outer product -> pure VPU broadcast multiply; skip the MXU.
        h1 = w1_ref[...] * xt                  # (hid,1)*(1,T) -> (hid,T)
    else:
        h1 = jnp.dot(w1_ref[...], xt, preferred_element_type=jnp.float32)
    h1 = jnp.maximum(h1 + b1_ref[...], 0.0)

    # ---- Layer 2: Linear + ReLU  (hidden x hidden -> MXU) ----
    h2 = jnp.dot(w2_ref[...], h1, preferred_element_type=jnp.float32)
    h2 = jnp.maximum(h2 + b2_ref[...], 0.0)

    # ---- Layer 3: Linear  (W3 @ h2 + b3) ----
    if out_size == 1:
        # N == 1: dot-product reduction -> VPU multiply + XLU sublane reduce.
        h3 = jnp.sum(w3t_ref[...] * h2, axis=0, keepdims=True)
    else:
        # contract over hidden (axis 0 of both) -> (out_size, TILE_N)
        h3 = lax.dot_general(w3t_ref[...], h2, (((0,), (0,)), ((), ())),
                             preferred_element_type=jnp.float32)
    h3 = h3 + b3_ref[...]

    # ---- Sigmoid: exp (EUP) + approx reciprocal (EUP), no VALU divide ----
    out_ref[...] = pl.reciprocal(1.0 + jnp.exp(-h3),
                                 approx=True).astype(out_ref.dtype)


def discriminator_forward(x, params, *, tile_n=512):
    """x: (N, input_size) f32.  Returns (N, output_size) f32.

    params layout (for `W @ x_T` compute):
      w1 (hidden, in), w2 (hidden, hidden): PyTorch (out_features, in_features)
      w3t (hidden, out): PyTorch map3 weight transposed
      b1/b2/b3: column vectors (out_features, 1)
    """
    n, in_size = x.shape
    out_size = params["w3t"].shape[1]

    # Lane-dense tiling: batch on lanes; pad N up to a multiple of the tile.
    tile_n = min(tile_n, ((n + 127) // 128) * 128)
    n_pad = pl.cdiv(n, tile_n) * tile_n

    xt = x.T                                            # (in_size, N)
    if n_pad != n:
        xt = jnp.pad(xt, ((0, 0), (0, n_pad - n)))      # zero-pad tail tile

    def const_spec(arr):
        # Whole array, same block every step -> stays resident in VMEM.
        return pl.BlockSpec(arr.shape, lambda i: (0, 0))

    out_t = pl.pallas_call(
        discriminator_kernel,
        out_shape=jax.ShapeDtypeStruct((out_size, n_pad), jnp.float32),
        grid=(n_pad // tile_n,),
        in_specs=[
            pl.BlockSpec((in_size, tile_n), lambda i: (0, i)),   # x tile
            const_spec(params["w1"]),
            const_spec(params["b1"]),
            const_spec(params["w2"]),
            const_spec(params["b2"]),
            const_spec(params["w3t"]),
            const_spec(params["b3"]),
        ],
        out_specs=pl.BlockSpec((out_size, tile_n), lambda i: (0, i)),
        compiler_params=pltpu.CompilerParams(
            # Batch tiles are independent -> megacore split on v7x.
            # VMEM budget: weights (<20 KiB) + 2x double-buffered x/out tiles
            # + (hidden, tile_n) intermediates << 32 MiB scoped default on
            # every generation, so no vmem_limit_bytes override is needed.
            dimension_semantics=("parallel",)),
    )(xt, params["w1"], params["b1"], params["w2"], params["b2"],
      params["w3t"], params["b3"])

    return out_t[:, :n].T                               # (N, out_size)


def init_params(key, input_size, hidden_size, output_size):
    """PyTorch nn.Linear default init (uniform +-1/sqrt(fan_in)),
    stored in the kernel's `W @ x_T` layout."""
    ks = jax.random.split(key, 6)

    def linear(kw, kb, fan_in, fan_out):
        bound = 1.0 / float(fan_in) ** 0.5
        w = jax.random.uniform(kw, (fan_out, fan_in), jnp.float32, -bound, bound)
        b = jax.random.uniform(kb, (fan_out, 1), jnp.float32, -bound, bound)
        return w, b

    w1, b1 = linear(ks[0], ks[1], input_size, hidden_size)
    w2, b2 = linear(ks[2], ks[3], hidden_size, hidden_size)
    w3, b3 = linear(ks[4], ks[5], hidden_size, output_size)
    return {"w1": w1, "b1": b1, "w2": w2, "b2": b2, "w3t": w3.T, "b3": b3}


def reference_forward(x, p):
    h1 = jnp.maximum(x @ p["w1"].T + p["b1"].T, 0.0)
    h2 = jnp.maximum(h1 @ p["w2"].T + p["b2"].T, 0.0)
    return jax.nn.sigmoid(h2 @ p["w3t"] + p["b3"].T)


if __name__ == "__main__":
    key = jax.random.PRNGKey(0)

    # The script uses Discriminator(input_size=1, hidden, output_size=1) over
    # x = linspace(-5, 5, 1000).view(1000, 1).
    batch, input_size, hidden_size, output_size = 1000, 1, 32, 1

    x = jnp.linspace(-5.0, 5.0, batch * input_size,
                     dtype=jnp.float32).reshape(batch, input_size)
    params = init_params(key, input_size, hidden_size, output_size)

    out = discriminator_forward(x, params)
    out = jax.block_until_ready(out)

    ref = reference_forward(x, params)
    assert out.shape == (batch, output_size)
    # approx EUP reciprocal in the sigmoid -> allow a small absolute slack.
    assert jnp.allclose(out, ref, atol=5e-3, rtol=0.0), float(
        jnp.max(jnp.abs(out - ref)))

    print("KERNEL_OK")
</pallas_src>

<mosaic_0001>
module attributes {stable_mosaic.version = 11 : i64} {
  func.func @discriminator_kernel(%arg0: i32, %arg1: memref<1x512xf32, #tpu.memory_space<vmem>>, %arg2: memref<32x1xf32, #tpu.memory_space<vmem>>, %arg3: memref<32x1xf32, #tpu.memory_space<vmem>>, %arg4: memref<32x32xf32, #tpu.memory_space<vmem>>, %arg5: memref<32x1xf32, #tpu.memory_space<vmem>>, %arg6: memref<32x1xf32, #tpu.memory_space<vmem>>, %arg7: memref<1x1xf32, #tpu.memory_space<vmem>>, %arg8: memref<1x512xf32, #tpu.memory_space<vmem>>) attributes {dimension_semantics = [#tpu.dimension_semantics<parallel>], iteration_bounds = array<i64: 2>, scalar_prefetch = 0 : i64, scratch_operands = 0 : i64, tpu.core_type = #tpu.core_type<tc>, window_params = [{transform_indices = @transform_0, window_bounds = array<i64: 1, 512>}, {pipeline_mode = #tpu.pipeline_mode<synchronous>, transform_indices = @transform_1, window_bounds = array<i64: 32, 1>}, {pipeline_mode = #tpu.pipeline_mode<synchronous>, transform_indices = @transform_2, window_bounds = array<i64: 32, 1>}, {pipeline_mode = #tpu.pipeline_mode<synchronous>, transform_indices = @transform_3, window_bounds = array<i64: 32, 32>}, {pipeline_mode = #tpu.pipeline_mode<synchronous>, transform_indices = @transform_4, window_bounds = array<i64: 32, 1>}, {pipeline_mode = #tpu.pipeline_mode<synchronous>, transform_indices = @transform_5, window_bounds = array<i64: 32, 1>}, {pipeline_mode = #tpu.pipeline_mode<synchronous>, transform_indices = @transform_6, window_bounds = array<i64: 1, 1>}, {transform_indices = @transform_7, window_bounds = array<i64: 1, 512>}]} {
    %c0 = arith.constant 0 : index
    %c0_0 = arith.constant 0 : index
    %0 = vector.load %arg1[%c0, %c0_0] : memref<1x512xf32, #tpu.memory_space<vmem>>, vector<1x512xf32>
    %c0_1 = arith.constant 0 : index
    %c0_2 = arith.constant 0 : index
    %1 = vector.load %arg2[%c0_1, %c0_2] : memref<32x1xf32, #tpu.memory_space<vmem>>, vector<32x1xf32>
    %2 = vector.broadcast %1 : vector<32x1xf32> to vector<32x512xf32>
    %3 = vector.broadcast %0 : vector<1x512xf32> to vector<32x512xf32>
    %4 = arith.mulf %2, %3 : vector<32x512xf32>
    %c0_3 = arith.constant 0 : index
    %c0_4 = arith.constant 0 : index
    %5 = vector.load %arg3[%c0_3, %c0_4] : memref<32x1xf32, #tpu.memory_space<vmem>>, vector<32x1xf32>
    %6 = vector.broadcast %5 : vector<32x1xf32> to vector<32x512xf32>
    %7 = arith.addf %4, %6 : vector<32x512xf32>
    %cst = arith.constant 0.000000e+00 : f32
    %8 = vector.broadcast %cst : f32 to vector<32x512xf32>
    %9 = arith.maximumf %7, %8 : vector<32x512xf32>
    %c0_5 = arith.constant 0 : index
    %c0_6 = arith.constant 0 : index
    %10 = vector.load %arg4[%c0_5, %c0_6] : memref<32x32xf32, #tpu.memory_space<vmem>>, vector<32x32xf32>
    %cst_7 = arith.constant dense<0.000000e+00> : vector<32x512xf32>
    %11 = tpu.matmul %10, %9, %cst_7 {dimension_numbers = #tpu.dot_dimension_numbers<[1], [0], [0], [1], [0, 0, 1, 1], [], []>} : vector<32x32xf32>, vector<32x512xf32>, vector<32x512xf32> -> vector<32x512xf32>
    %c0_8 = arith.constant 0 : index
    %c0_9 = arith.constant 0 : index
    %12 = vector.load %arg5[%c0_8, %c0_9] : memref<32x1xf32, #tpu.memory_space<vmem>>, vector<32x1xf32>
    %13 = vector.broadcast %12 : vector<32x1xf32> to vector<32x512xf32>
    %14 = arith.addf %11, %13 : vector<32x512xf32>
    %cst_10 = arith.constant 0.000000e+00 : f32
    %15 = vector.broadcast %cst_10 : f32 to vector<32x512xf32>
    %16 = arith.maximumf %14, %15 : vector<32x512xf32>
    %c0_11 = arith.constant 0 : index
    %c0_12 = arith.constant 0 : index
    %17 = vector.load %arg6[%c0_11, %c0_12] : memref<32x1xf32, #tpu.memory_space<vmem>>, vector<32x1xf32>
    %18 = vector.broadcast %17 : vector<32x1xf32> to vector<32x512xf32>
    %19 = arith.mulf %18, %16 : vector<32x512xf32>
    %cst_13 = arith.constant dense<0.000000e+00> : vector<512xf32>
    %20 = vector.multi_reduction <add>, %19, %cst_13 [0] : vector<32x512xf32> to vector<512xf32>
    %21 = vector.shape_cast %20 : vector<512xf32> to vector<1x512xf32>
    %c0_14 = arith.constant 0 : index
    %c0_15 = arith.constant 0 : index
    %22 = vector.load %arg7[%c0_14, %c0_15] : memref<1x1xf32, #tpu.memory_space<vmem>>, vector<1x1xf32>
    %23 = vector.broadcast %22 : vector<1x1xf32> to vector<1x512xf32>
    %24 = arith.addf %21, %23 : vector<1x512xf32>
    %cst_16 = arith.constant 0.000000e+00 : f32
    %25 = vector.broadcast %cst_16 : f32 to vector<1x512xf32>
    %26 = arith.subf %25, %24 : vector<1x512xf32>
    %27 = math.exp %26 : vector<1x512xf32>
    %cst_17 = arith.constant 1.000000e+00 : f32
    %28 = vector.broadcast %cst_17 : f32 to vector<1x512xf32>
    %29 = arith.addf %28, %27 : vector<1x512xf32>
    %30 = tpu.reciprocal %29 {approx = true} : vector<1x512xf32> -> vector<1x512xf32>
    %c0_18 = arith.constant 0 : index
    %c0_19 = arith.constant 0 : index
    %31 = vector.load %arg8[%c0_18, %c0_19] : memref<1x512xf32, #tpu.memory_space<vmem>>, vector<1x512xf32>
    tpu.vector_store %arg8[%c0_18, %c0_19], %30 {strides = array<i32>} : memref<1x512xf32, #tpu.memory_space<vmem>>, vector<1x512xf32>,
    return
  }
  func.func @transform_0(%arg0: i32) -> (i32, i32) {
    %c0_i32 = arith.constant 0 : i32
    %c0_i32_0 = arith.constant 0 : i32
    return %c0_i32, %arg0 : i32, i32
  }
  func.func @transform_1(%arg0: i32) -> (i32, i32) {
    %c0_i32 = arith.constant 0 : i32
    %c0_i32_0 = arith.constant 0 : i32
    %c0_i32_1 = arith.constant 0 : i32
    return %c0_i32, %c0_i32_0 : i32, i32
  }
  func.func @transform_2(%arg0: i32) -> (i32, i32) {
    %c0_i32 = arith.constant 0 : i32
    %c0_i32_0 = arith.constant 0 : i32
    %c0_i32_1 = arith.constant 0 : i32
    return %c0_i32, %c0_i32_0 : i32, i32
  }
  func.func @transform_3(%arg0: i32) -> (i32, i32) {
    %c0_i32 = arith.constant 0 : i32
    %c0_i32_0 = arith.constant 0 : i32
    %c0_i32_1 = arith.constant 0 : i32
    return %c0_i32, %c0_i32_0 : i32, i32
  }
  func.func @transform_4(%arg0: i32) -> (i32, i32) {
    %c0_i32 = arith.constant 0 : i32
    %c0_i32_0 = arith.constant 0 : i32
    %c0_i32_1 = arith.constant 0 : i32
    return %c0_i32, %c0_i32_0 : i32, i32
  }
  func.func @transform_5(%arg0: i32) -> (i32, i32) {
    %c0_i32 = arith.constant 0 : i32
    %c0_i32_0 = arith.constant 0 : i32
    %c0_i32_1 = arith.constant 0 : i32
    return %c0_i32, %c0_i32_0 : i32, i32
  }
  func.func @transform_6(%arg0: i32) -> (i32, i32) {
    %c0_i32 = arith.constant 0 : i32
    %c0_i32_0 = arith.constant 0 : i32
    %c0_i32_1 = arith.constant 0 : i32
    return %c0_i32, %c0_i32_0 : i32, i32
  }
  func.func @transform_7(%arg0: i32) -> (i32, i32) {
    %c0_i32 = arith.constant 0 : i32
    %c0_i32_0 = arith.constant 0 : i32
    return %c0_i32, %arg0 : i32, i32
  }
}

</mosaic_0001>

<bundles_post_ra>
// kernel: tpu_custom_call.1
= control target key start
LH: loop header
LB: loop body
LE: loop exit
PB: predicated region body
PF: predicated region fallthrough
CT: control target
= control target key end

     0   :  { %s1211_s0 = inlined_call_operand.vmem [shape: f32[1,1024], index: 0, kind: input, shape index: {}]   ;;  %s1212_s1 = inlined_call_operand.vmem [shape: f32[32,1], index: 1, kind: input, shape index: {}]   ;;  %s1213_s2 = inlined_call_operand.vmem [shape: f32[32,1], index: 2, kind: input, shape index: {}]   ;;  %s1214_s3 = inlined_call_operand.vmem [shape: f32[32,32], index: 3, kind: input, shape index: {}]   ;;  %s1215_s4 = inlined_call_operand.vmem [shape: f32[32,1], index: 4, kind: input, shape index: {}]   ;;  %s1216_s5 = inlined_call_operand.vmem [shape: f32[32,1], index: 5, kind: input, shape index: {}]   ;;  %s1217_s6 = inlined_call_operand.<no memory space> [shape: f32[1,1], index: 6, kind: input, shape index: {}]   ;;  %s1218_s7 = inlined_call_operand.hbm [shape: f32[1,1024], index: 7, kind: output, shape index: {}]  }
   0x1   :  { %v12_v0 = vstv %s1217_s6 }
   0x2   :  { %13 = vst [vmem:[#allocation2] sm:$0x1] %v12_v0 }
   0x3   :  { %14 = vsyncpa [#allocation4], 0 }
   0x4   :  { %16 = vsyncpa [#allocation4 + $0x1], 0  ;;  %s1036_s26 = smov 0   ;;  %s1038_s27 = smov 0  }
   0x5   :  { %s1040_s28 = smov 0   ;;  %s1042_s29 = smov 0  }
   0x6 LB: > { %s1057_s6 = sadd.s32 4294967295, %s987_s29   ;;  %s847_s30 = sadd.s32 4294967294, %s987_s29   ;;  %s987_s29 = sphi %s1042_s29, %s1224_s29   ;;  %s983_s28 = sphi %s1040_s28, %s1223_s28   ;;  %s979_s27 = sphi %s1038_s27, %s1222_s27   ;;  %s975_s26 = sphi %s1036_s26, %s1221_s26  }
   0x7   : > { %s1061_s8 = sadd.s32 1, %s987_s29   ;;  %s181_s9 = sadd.s32 1, %s983_s28 }
   0x8   : > { %s178_s10 = ssub.s32 %s987_s29, %s1061_s8  ;;  %p191_p0 = scmp.ne.s32.totalorder %s983_s28, %s979_s27 }
   0x9   : > { %p179_p1 = scmp.eq.s32.totalorder %s178_s10, 0  ;;  %p192_p2 = scmp.eq.s32.totalorder %s1057_s6, 1 }
   0xa   : > { %p197_p3 = scmp.ne.s32.totalorder %s979_s27, %s975_s26  ;;  %p198_p4 = scmp.eq.s32.totalorder %s847_s30, 1 }
   0xb   : > { %s1072_s11 = scalar_select %p179_p1, %s983_s28, %s181_s9  }
   0xc   : > { %p1074_p5 = por %p192_p2, %p191_p0  ;;  %p1078_p6 = por %p198_p4, %p197_p3 }
   0xd   : > { %p850_p7 = scmp.ge.s32.totalorder %s987_s29, 1  ;;  %p242_p8 = scmp.lt.s32.totalorder %s987_s29, 3 }
   0xf   : > { %p243_p9 = pnand %p850_p7, %p242_p8 }
  0x10   : > { %s852_s16 = sshll.u32 (!%p243_p9), %s1057_s6, 2  ;;  %s270_s10 = sand.u32 (!%p243_p9), 1, %s979_s27  }
  0x11   : > { %246 = sbr.rel (%p243_p9) target bundleno = 454 (0x1c6), region = 48  ;;  %p274_p10 = scmp.lt.s32.totalorder (!%p243_p9), %s852_s16, 7 }
  0x12   : > { %s851_s14 = sshll.u32 (!%p243_p9), %s270_s10, 2  ;;  %s866_s15 = sshll.u32 (!%p243_p9), %s1057_s6, 6 }
  0x13   : > { %s789_s20 = scalar_lea.hbm (!%p243_p9), %s1218_s7, %s866_s15  ;;  %s777_s21 = scalar_lea.sflag (!%p243_p9), [#allocation4], %s270_s10 }
  0x14   : > { %s992_s23 = smov (!%p243_p9), [#allocation3]  }
  0x15   : > { %s931_s6 = sshll.u32 (!%p243_p9), %s992_s23, 4  ;;  %s932_s6 = int_to_ptr.vmem [resolvable:$false] %s931_s6 }
  0x16   : > { %v344_v1 = vld [vmem:[%s1213_s2 + $0x18] sm:$0xff]  ;;  %v989_v3 = vmov 0   ;;  %v282_v4 = vld [vmem:[%s1212_s1 + $0x10] sm:$0xff]  ;;  %v281_v5 = vld [vmem:[%s1212_s1 + $0x8] sm:$0xff]  ;;  %v990_v12 = vmov 0.0   ;;  %v305_v20 = vlaneseq  ;;  %s1226_s16 = smov (!%p274_p10, %s852_s16), 7 }
  0x17   : > { %v283_v2 = vld [vmem:[%s1212_s1 + $0x18] sm:$0xff]  ;;  %910 = vset.pattern.permute.xlu1 %v989_v3  ;;  %909 = vset.pattern.permute.xlu0 %v989_v3  ;;  %v343_v6 = vld [vmem:[%s1213_s2 + $0x10] sm:$0xff]  ;;  %v280_v7 = vld [vmem:[%s1212_s1] sm:$0xff]  ;;  %s276_s19 = scalar_lea.vmem %s1211_s0, %s1226_s16  ;;  %vm425_vm0 = vcmask 261120   ;;  %s272_s16 = scalar_lea.vmem [#allocation3], %s851_s14 }
  0x18   : > { %362 = vperm.xlu1 %910, %v344_v1   ;;  %301 = vperm.xlu0 %909, %v283_v2   ;;  %v342_v8 = vld [vmem:[%s1213_s2 + $0x8] sm:$0xff]  ;;  %v341_v9 = vld [vmem:[%s1213_s2] sm:$0xff]  ;;  %v403_v13 = vld [vmem:[%s1215_s4 + $0x10] sm:$0xff]  ;;  %v1136_v21 = vshrl.u32 %v305_v20, 7  ;;  %s791_s17 = sshll.u32 %s272_s16, 4  ;;  %vm773_vm1 = vcmp.lt.s32.totalorder %v305_v20, 512  ;;  %s792_s17 = int_to_ptr.vmem [resolvable:$true] %s791_s17 }
  0x19   : > { %v401_v10 = vld [vmem:[%s1215_s4] sm:$0xff]  ;;  %v402_v11 = vld [vmem:[%s1215_s4 + $0x8] sm:$0xff]  ;;  %502 = vmatprep.mubr.f32.mxu0 %v990_v12  ;;  %591 = vmatprep.mubr.f32.mxu1 %v990_v12  ;;  %v404_v14 = vld [vmem:[%s1215_s4 + $0x18] sm:$0xff]  ;;  %s927_s22 = scalar_lea.vmem %s792_s17, 64  ;;  %s933_s24 = scalar_lea.vmem %s932_s6, 128 }
  0x1a   : > { %v632_v15 = vld [vmem:[%s1216_s5] sm:$0xff]  ;;  %v633_v16 = vld [vmem:[%s1216_s5 + $0x8] sm:$0xff]  ;;  %v634_v17 = vld [vmem:[%s1216_s5 + $0x10] sm:$0xff]  ;;  %v307_v22 = vsub.s32 0, %v1136_v21  ;;  %v311_v23 = vsub.s32 1, %v1136_v21  ;;  %v315_v24 = vsub.s32 2, %v1136_v21  ;;  %p928_p11 = scmp.ne.s32.totalorder %s792_s17, %s927_s22  ;;  %p934_p0 = scmp.lt.s32.totalorder %s792_s17, %s932_s6 }
  0x1b   : > { %v635_v18 = vld [vmem:[%s1216_s5 + $0x18] sm:$0xff]  ;;  %v708_v19 = vld [vmem:[#allocation2] sm:$0x1]  ;;  %v319_v25 = vsub.s32 3, %v1136_v21  ;;  %p935_p1 = scmp.lt.s32.totalorder %s933_s24, %s927_s22 }
  0x1c   : > { %296 = vperm.xlu0 %909, %v282_v4   ;;  %291 = vperm.xlu1 %910, %v281_v5   ;;  %v279_v26 = vld [vmem:[%s276_s19] sm:$0xf]  ;;  %p929_p12 = pnand %p928_p11, %p1074_p5 }
  0x1d   : > { %v308_v27 = vrot.slane %v279_v26, %v307_v22  ;;  %v312_v28 = vrot.slane %v279_v26, %v311_v23  ;;  %v316_v29 = vrot.slane %v279_v26, %v315_v24  ;;  %v320_v30 = vrot.slane %v279_v26, %v319_v25  ;;  %p936_p2 = por %p935_p1, %p934_p0 }
  0x1e   : > { %p930_p13 = pneg %p929_p12 }
  0x20   : > { %357 = vperm.xlu0 %909, %v343_v6   ;;  %286 = vperm.xlu1 %910, %v280_v7   ;;  %p937_p3 = pnand %p936_p2, %p930_p13 }
  0x24   : > { %352 = vperm.xlu0 %909, %v342_v8   ;;  %347 = vperm.xlu1 %910, %v341_v9  }
  0x28   : > { %407 = vperm.xlu0 %909, %v401_v10   ;;  %412 = vperm.xlu1 %910, %v402_v11  }
  0x2c   : > { %417 = vperm.xlu0 %909, %v403_v13   ;;  %422 = vperm.xlu1 %910, %v404_v14  }
  0x30   : > { %638 = vperm.xlu0 %909, %v632_v15   ;;  %643 = vperm.xlu1 %910, %v633_v16  }
  0x34   : > { %648 = vperm.xlu0 %909, %v634_v17   ;;  %653 = vperm.xlu1 %910, %v635_v18  }
  0x38   : > { %711 = vperm.xlu0 %909, %v708_v19  }
  0x93   : > { %v363_v31 = vpop.permute.xlu1 %362  ;;  %v302_v32 = vpop.permute.xlu0 %301 }
  0x94   : > { %v338_v33 = vmul.f32 %v312_v28, %v302_v32  ;;  %v340_v34 = vmul.f32 %v320_v30, %v302_v32  ;;  %v337_v35 = vmul.f32 %v308_v27, %v302_v32  ;;  %v339_v36 = vmul.f32 %v316_v29, %v302_v32 }
  0x96   : > { %v378_v37 = vadd.f32 %v363_v31, %v338_v33  ;;  %v380_v38 = vadd.f32 %v363_v31, %v340_v34  ;;  %v377_v39 = vadd.f32 %v363_v31, %v337_v35  ;;  %v379_v40 = vadd.f32 %v363_v31, %v339_v36 }
  0x97   : > { %v297_v41 = vpop.permute.xlu0 %296  ;;  %v292_v42 = vpop.permute.xlu1 %291 }
  0x98   : > { %v394_v43 = vmax.f32 %v378_v37, 0.0  ;;  %v396_v44 = vmax.f32 %v380_v38, 0.0  ;;  %v393_v45 = vmax.f32 %v377_v39, 0.0  ;;  %v395_v46 = vmax.f32 %v379_v40, 0.0 }
  0x99   : > { %v333_v47 = vmul.f32 %v308_v27, %v297_v41  ;;  %v334_v48 = vmul.f32 %v312_v28, %v297_v41  ;;  %v335_v49 = vmul.f32 %v316_v29, %v297_v41  ;;  %v336_v50 = vmul.f32 %v320_v30, %v297_v41 }
  0x9a   : > { %v329_v53 = vmul.f32 %v308_v27, %v292_v42  ;;  %v330_v54 = vmul.f32 %v312_v28, %v292_v42  ;;  %v331_v55 = vmul.f32 %v316_v29, %v292_v42  ;;  %462 = vmatprep.subr.mxu0 %v394_v43  ;;  %551 = vmatprep.subr.mxu1 %v396_v44 }
  0x9b   : > { %v358_v51 = vpop.permute.xlu0 %357  ;;  %v287_v52 = vpop.permute.xlu1 %286  ;;  %v332_v56 = vmul.f32 %v320_v30, %v292_v42  ;;  %463 = vmatpush1.msra.mxu0 %v393_v45  ;;  %552 = vmatpush1.msra.mxu1 %v395_v46 }
  0x9c   : > { %v374_v57 = vadd.f32 %v358_v51, %v334_v48  ;;  %v376_v58 = vadd.f32 %v358_v51, %v336_v50  ;;  %v325_v59 = vmul.f32 %v308_v27, %v287_v52  ;;  %v326_v60 = vmul.f32 %v312_v28, %v287_v52  ;;  %v397_v27 = vld [vmem:[%s1214_s3] sm:$0xff]  ;;  %v398_v28 = vld [vmem:[%s1214_s3 + $0x8] sm:$0xff] }
  0x9d   : > { %v373_v61 = vadd.f32 %v358_v51, %v333_v47  ;;  %v375_v62 = vadd.f32 %v358_v51, %v335_v49  ;;  %v327_v63 = vmul.f32 %v316_v29, %v287_v52  ;;  %v328_v0 = vmul.f32 %v320_v30, %v287_v52  ;;  %v399_v29 = vld [vmem:[%s1214_s3 + $0x10] sm:$0xff]  ;;  %v400_v30 = vld [vmem:[%s1214_s3 + $0x18] sm:$0xff] }
  0x9e   : > { %v390_v3 = vmax.f32 %v374_v57, 0.0  ;;  %v392_v4 = vmax.f32 %v376_v58, 0.0 }
  0x9f   : > { %v353_v1 = vpop.permute.xlu0 %352  ;;  %v348_v2 = vpop.permute.xlu1 %347  ;;  %v389_v5 = vmax.f32 %v373_v61, 0.0  ;;  %v391_v6 = vmax.f32 %v375_v62, 0.0 }
  0xa0   : > { %v370_v7 = vadd.f32 %v353_v1, %v330_v54  ;;  %v372_v8 = vadd.f32 %v353_v1, %v332_v56  ;;  %464 = vmatprep.subr.mxu0 %v390_v3  ;;  %553 = vmatprep.subr.mxu1 %v392_v4  ;;  %v369_v9 = vadd.f32 %v353_v1, %v329_v53 }
  0xa1   : > { %v371_v10 = vadd.f32 %v353_v1, %v331_v55  ;;  %v366_v11 = vadd.f32 %v348_v2, %v326_v60  ;;  %465 = vmatpush1.msra.mxu0 %v389_v5  ;;  %554 = vmatpush1.msra.mxu1 %v391_v6  ;;  %v368_v15 = vadd.f32 %v348_v2, %v328_v0 }
  0xa2   : > { %v386_v13 = vmax.f32 %v370_v7, 0.0  ;;  %v388_v14 = vmax.f32 %v372_v8, 0.0  ;;  %v365_v16 = vadd.f32 %v348_v2, %v325_v59  ;;  %v385_v17 = vmax.f32 %v369_v9, 0.0 }
  0xa3   : > { %v387_v18 = vmax.f32 %v371_v10, 0.0  ;;  %v367_v19 = vadd.f32 %v348_v2, %v327_v63  ;;  %v382_v23 = vmax.f32 %v366_v11, 0.0  ;;  %v384_v24 = vmax.f32 %v368_v15, 0.0  ;;  %v408_v31 = vpop.permute.xlu0 %407  ;;  %v413_v32 = vpop.permute.xlu1 %412 }
  0xa4   : > { %466 = vmatprep.subr.mxu0 %v386_v13  ;;  %555 = vmatprep.subr.mxu1 %v388_v14  ;;  %v381_v25 = vmax.f32 %v365_v16, 0.0 }
  0xa5   : > { %467 = vmatpush1.msra.mxu0 %v385_v17  ;;  %556 = vmatpush1.msra.mxu1 %v387_v18  ;;  %v383_v26 = vmax.f32 %v367_v19, 0.0 }
  0xa6   : > { %468 = vmatprep.subr.mxu0 %v382_v23  ;;  %557 = vmatprep.subr.mxu1 %v384_v24 }
  0xa7   : > { %469 = vmatpush1.msra.mxu0 %v381_v25  ;;  %558 = vmatpush1.msra.mxu1 %v383_v26  ;;  %v418_v33 = vpop.permute.xlu0 %417  ;;  %v423_v40 = vpop.permute.xlu1 %422 }
  0xa8   : > { %853 = vmatmul.mubr.msk.f32.vlgmr.msra.gmra.mxu0 %vm425_vm0, %v397_v27  ;;  %857 = vmatmul.mubr.msk.f32.vlgmr.msra.gmra.mxu1 %vm425_vm0, %v397_v27 }
  0xa9   : > { %508 = vmatprep.mubr.f32.mxu0 %v990_v12  ;;  %597 = vmatprep.mubr.f32.mxu1 %v990_v12 }
  0xab   : > { %v639_v44 = vpop.permute.xlu0 %638  ;;  %v644_v59 = vpop.permute.xlu1 %643 }
  0xac   : > { %854 = vmatmul.mubr.msk.f32.gmra.mxu0 %vm425_vm0, %v398_v28  ;;  %858 = vmatmul.mubr.msk.f32.gmra.mxu1 %vm425_vm0, %v398_v28 }
  0xad   : > { %514 = vmatprep.mubr.f32.mxu0 %v990_v12  ;;  %603 = vmatprep.mubr.f32.mxu1 %v990_v12 }
  0xaf   : > { %v649_v4 = vpop.permute.xlu0 %648 }
  0xb0   : > { %855 = vmatmul.mubr.msk.f32.gmra.mxu0 %vm425_vm0, %v399_v29  ;;  %859 = vmatmul.mubr.msk.f32.gmra.mxu1 %vm425_vm0, %v399_v29 }
  0xb1   : > { %520 = vmatprep.mubr.f32.mxu0 %v990_v12  ;;  %609 = vmatprep.mubr.f32.mxu1 %v990_v12 }
  0xb4   : > { %856 = vmatmul.mubr.msk.f32.gmra.mxu0 %vm425_vm0, %v400_v30  ;;  %860 = vmatmul.mubr.msk.f32.gmra.mxu1 %vm425_vm0, %v400_v30 }
 0x168   : > { %v504_v34 = vpop.f32.mrf.mxu0  ;;  %v593_v35 = vpop.f32.mrf.mxu1 }
 0x169   : > { %v505_v36 = vadd.f32 %v504_v34, %v408_v31  ;;  %v594_v37 = vadd.f32 %v593_v35, %v408_v31 }
 0x16a   : > { %v506_v38 = vpop.f32.mrf.mxu0  ;;  %v595_v39 = vpop.f32.mrf.mxu1 }
 0x16b   : > { %v507_v41 = vadd.f32 %v506_v38, %v408_v31  ;;  %v596_v12 = vadd.f32 %v595_v39, %v408_v31  ;;  %v616_v45 = vmax.f32 %v505_v36, 0.0  ;;  %v618_v46 = vmax.f32 %v594_v37, 0.0  ;;  %v654_v37 = vpop.permute.xlu1 %653 }
 0x16c   : > { %v510_v42 = vpop.f32.mrf.mxu0  ;;  %v599_v43 = vpop.f32.mrf.mxu1 }
 0x16d   : > { %v511_v47 = vadd.f32 %v510_v42, %v413_v32  ;;  %v600_v48 = vadd.f32 %v599_v43, %v413_v32  ;;  %v617_v53 = vmax.f32 %v507_v41, 0.0  ;;  %v619_v54 = vmax.f32 %v596_v12, 0.0 }
 0x16e   : > { %v512_v49 = vpop.f32.mrf.mxu0  ;;  %v601_v50 = vpop.f32.mrf.mxu1  ;;  %v656_v0 = vmul.f32 %v639_v44, %v616_v45  ;;  %v658_v1 = vmul.f32 %v639_v44, %v618_v46 }
 0x16f   : > { %v513_v51 = vadd.f32 %v512_v49, %v413_v32  ;;  %v602_v52 = vadd.f32 %v601_v50, %v413_v32  ;;  %v620_v55 = vmax.f32 %v511_v47, 0.0  ;;  %v622_v56 = vmax.f32 %v600_v48, 0.0 }
 0x170   : > { %v516_v57 = vpop.f32.mrf.mxu0  ;;  %v605_v58 = vpop.f32.mrf.mxu1  ;;  %v657_v9 = vmul.f32 %v639_v44, %v617_v53  ;;  %v659_v10 = vmul.f32 %v639_v44, %v619_v54 }
 0x171   : > { %v621_v60 = vmax.f32 %v513_v51, 0.0  ;;  %v623_v61 = vmax.f32 %v602_v52, 0.0  ;;  %v517_v62 = vadd.f32 %v516_v57, %v418_v33  ;;  %v606_v63 = vadd.f32 %v605_v58, %v418_v33 }
 0x172   : > { %v518_v2 = vpop.f32.mrf.mxu0  ;;  %v607_v3 = vpop.f32.mrf.mxu1  ;;  %v660_v5 = vmul.f32 %v644_v59, %v620_v55  ;;  %v662_v6 = vmul.f32 %v644_v59, %v622_v56 }
 0x173   : > { %v624_v7 = vmax.f32 %v517_v62, 0.0  ;;  %v626_v8 = vmax.f32 %v606_v63, 0.0  ;;  %v519_v11 = vadd.f32 %v518_v2, %v418_v33  ;;  %v608_v13 = vadd.f32 %v607_v3, %v418_v33  ;;  %v712_v3 = vpop.permute.xlu0 %711 }
 0x174   : > { %v522_v14 = vpop.f32.mrf.mxu0  ;;  %v611_v15 = vpop.f32.mrf.mxu1  ;;  %v661_v16 = vmul.f32 %v644_v59, %v621_v60  ;;  %v663_v17 = vmul.f32 %v644_v59, %v623_v61  ;;  %v672_v29 = vadd.f32 %v660_v5, %v656_v0  ;;  %v690_v30 = vadd.f32 %v662_v6, %v658_v1 }
 0x175   : > { %v664_v18 = vmul.f32 %v649_v4, %v624_v7  ;;  %v666_v19 = vmul.f32 %v649_v4, %v626_v8  ;;  %v625_v23 = vmax.f32 %v519_v11, 0.0  ;;  %v627_v24 = vmax.f32 %v608_v13, 0.0 }
 0x176   : > { %v523_v25 = vadd.f32 %v522_v14, %v423_v40  ;;  %v612_v26 = vadd.f32 %v611_v15, %v423_v40  ;;  %v524_v27 = vpop.f32.mrf.mxu0  ;;  %v613_v28 = vpop.f32.mrf.mxu1  ;;  %v681_v38 = vadd.f32 %v661_v16, %v657_v9  ;;  %v699_v39 = vadd.f32 %v663_v17, %v659_v10 }
 0x177   : > { %v525_v31 = vadd.f32 %v524_v27, %v423_v40  ;;  %v614_v32 = vadd.f32 %v613_v28, %v423_v40  ;;  %v665_v34 = vmul.f32 %v649_v4, %v625_v23  ;;  %v667_v35 = vmul.f32 %v649_v4, %v627_v24 }
 0x178   : > { %v628_v36 = vmax.f32 %v523_v25, 0.0  ;;  %v630_v33 = vmax.f32 %v612_v26, 0.0  ;;  %v673_v42 = vadd.f32 %v672_v29, %v664_v18  ;;  %v691_v43 = vadd.f32 %v690_v30, %v666_v19 }
 0x179   : > { %v629_v41 = vmax.f32 %v525_v31, 0.0  ;;  %v631_v12 = vmax.f32 %v614_v32, 0.0  ;;  %v682_v46 = vadd.f32 %v681_v38, %v665_v34  ;;  %v700_v47 = vadd.f32 %v699_v39, %v667_v35 }
 0x17a   : > { %v668_v44 = vmul.f32 %v654_v37, %v628_v36  ;;  %v670_v45 = vmul.f32 %v654_v37, %v630_v33  ;;  %v717_v10 = vrot.slane %v712_v3, %v307_v22  ;;  %v991_v38 = vmov 1966171168  }
 0x17b   : > { %v669_v48 = vmul.f32 %v654_v37, %v629_v41  ;;  %v671_v49 = vmul.f32 %v654_v37, %v631_v12  ;;  %v749_v39 = vunpack.c.l.s4 %v991_v38 }
 0x17c   : > { %v674_v50 = vadd.f32 %v673_v42, %v668_v44  ;;  %v692_v51 = vadd.f32 %v691_v43, %v670_v45 }
 0x17d   : > { %v683_v40 = vadd.f32 %v682_v46, %v669_v48  ;;  %v701_v52 = vadd.f32 %v700_v47, %v671_v49  ;;  %v750_v41 = vunpack.c.0.s8 %v749_v39 }
 0x17e   : > { %v675_v53 = vrot.slane %v674_v50, 4  ;;  %v693_v54 = vrot.slane %v692_v51, 4 }
 0x17f   : > { %v684_v55 = vrot.slane %v683_v40, 4  ;;  %v702_v56 = vrot.slane %v701_v52, 4  ;;  %v753_v43 = vsub.s32 %v750_v41, %v1136_v21 }
 0x180   : > { %v676_v57 = vadd.f32 %v675_v53, %v674_v50  ;;  %v694_v58 = vadd.f32 %v693_v54, %v692_v51 }
 0x181   : > { %v685_v59 = vadd.f32 %v684_v55, %v683_v40  ;;  %v703_v60 = vadd.f32 %v702_v56, %v701_v52 }
 0x182   : > { %v677_v61 = vrot.slane %v676_v57, 2  ;;  %v695_v62 = vrot.slane %v694_v58, 2 }
 0x183   : > { %v686_v63 = vrot.slane %v685_v59, 2  ;;  %v704_v0 = vrot.slane %v703_v60, 2 }
 0x184   : > { %v678_v1 = vadd.f32 %v677_v61, %v676_v57  ;;  %v696_v2 = vadd.f32 %v695_v62, %v694_v58 }
 0x185   : > { %v687_v4 = vadd.f32 %v686_v63, %v685_v59  ;;  %v705_v5 = vadd.f32 %v704_v0, %v703_v60 }
 0x186   : > { %v679_v6 = vrot.slane %v678_v1, 1  ;;  %v697_v7 = vrot.slane %v696_v2, 1 }
 0x187   : > { %v688_v8 = vrot.slane %v687_v4, 1  ;;  %v706_v9 = vrot.slane %v705_v5, 1 }
 0x188   : > { %v680_v11 = vadd.f32 %v679_v6, %v678_v1  ;;  %v698_v13 = vadd.f32 %v697_v7, %v696_v2 }
 0x189   : > { %v689_v14 = vadd.f32 %v688_v8, %v687_v4  ;;  %v707_v15 = vadd.f32 %v706_v9, %v705_v5 }
 0x18a   : > { %v718_v16 = vadd.f32 %v717_v10, %v680_v11  ;;  %v720_v17 = vadd.f32 %v717_v10, %v698_v13 }
 0x18b   : > { %v719_v18 = vadd.f32 %v717_v10, %v689_v14  ;;  %v721_v19 = vadd.f32 %v717_v10, %v707_v15 }
 0x18c   : > { %v722_v23 = vsub.f32 0.0, %v718_v16  ;;  %v724_v24 = vsub.f32 0.0, %v720_v17 }
 0x18d   : > { %v723_v25 = vsub.f32 0.0, %v719_v18  ;;  %v725_v26 = vsub.f32 0.0, %v721_v19 }
 0x18e   : > { %v726_v27 = vmul.f32 1.442695, %v722_v23  ;;  %v730_v28 = vmul.f32 1.442695, %v724_v24 }
 0x18f   : > { %v728_v29 = vmul.f32 1.442695, %v723_v25  ;;  %v732_v30 = vmul.f32 1.442695, %v725_v26 }
 0x190   : > { %911 = vpow2.f32 %v726_v27 }
 0x191   : > { %913 = vpow2.f32 %v730_v28 }
 0x192   : > { %915 = vpow2.f32 %v728_v29 }
 0x193   : > { %917 = vpow2.f32 %v732_v30 }
 0x19d   : > { %v912_v22 = vpop.eup %911 }
 0x19e   : > { %v914_v31 = vpop.eup %913  ;;  %v734_v32 = vadd.f32 1.0, %v912_v22 }
 0x19f   : > { %v916_v34 = vpop.eup %915  ;;  %v736_v35 = vadd.f32 1.0, %v914_v31 }
 0x1a0   : > { %v918_v36 = vpop.eup %917  ;;  %919 = vrcp.f32 %v734_v32  ;;  %v735_v33 = vadd.f32 1.0, %v916_v34 }
 0x1a1   : > { %921 = vrcp.f32 %v736_v35  ;;  %v737_v37 = vadd.f32 1.0, %v918_v36 }
 0x1a2   : > { %923 = vrcp.f32 %v735_v33 }
 0x1a3   : > { %925 = vrcp.f32 %v737_v37 }
 0x1ad   : > { %v920_v12 = vpop.eup %919 }
 0x1ae   : > { %v922_v42 = vpop.eup %921 }
 0x1af   : > { %v924_v44 = vpop.eup %923 }
 0x1b0   : > { %v926_v45 = vpop.eup %925  ;;  %v746_v46 = vcombine.low %v920_v12, %v924_v44 }
 0x1b1   : > { %v747_v47 = vcombine.low %v922_v42, %v926_v45 }
 0x1b2   : > { %v754_v48 = vrot.slane %v746_v46, %v753_v43 }
 0x1b3   : > { %v761_v49 = vrot.slane %v747_v47, %v753_v43 }
 0x1b5   : > { %v762_v50 = vcombine.low %v754_v48, %v761_v49 }
 0x1b7   : > { %v769_v51 = vrot.slane %v762_v50, %v753_v43 }
 0x1b9   : > { %775 = vst.msk [vmem:[%s272_s16] sm:$0xf] %vm773_vm1, %v769_v51 }
 0x1ba   : > { %940 = shalt.err (!%p937_p3)
}
 0x1bb   : > { %s941_s25 = scalar_lea.hbm %s789_s20, 64  ;;  %s945_s10 = scalar_lea.hbm %s1218_s7, 128 }
 0x1bc   : > { %p942_p4 = scmp.ne.s32.totalorder %s789_s20, %s941_s25  ;;  %p946_p9 = scmp.lt.s32.totalorder %s789_s20, %s1218_s7 }
 0x1bd   : > { %p947_p10 = scmp.lt.s32.totalorder %s945_s10, %s941_s25 }
 0x1be   : > { %p943_p7 = pnand %p942_p4, %p1074_p5 }
 0x1bf   : > { %p948_p11 = por %p947_p10, %p946_p9 }
 0x1c0   : > { %p944_p8 = pneg %p943_p7 }
 0x1c2   : > { %p949_p12 = pnand %p948_p11, %p944_p8 }
 0x1c4   : > { %952 = shalt.err (!%p949_p12)
}
 0x1c5   : > { %867 = dma.vmem_to_hbm [thread:$0]  (%p1074_p5), %s792_s17, 64, %s789_s20, %s777_s21  }
 0x1c6 PF: > { %p873_p13 = scmp.ge.s32.totalorder %s987_s29, 2  ;;  %s803_s16 = sand.u32 1, %s975_s26  }
 0x1c7   : > { %s804_s18 = scalar_lea.sflag [#allocation4], %s803_s16 }
 0x1c8   : > { %p870_p0 = pnand %p873_p13, %p1078_p6 }
 0x1ca   : > { %p871_p1 = pneg %p870_p0 }
 0x1cc   : > { %970 = dma.done.wait (%p871_p1), %s804_s18, 64  }
 0x1cd   : > { %972 = vsyncadd (%p871_p1), %s804_s18, 4294967232  ;;  %p19_p2 = scmp.ge.s32.totalorder %s1061_s8, 4   ;;  %s1221_s26 = smov %s979_s27 }
 0x1ce   : > { %s1222_s27 = smov %s983_s28  ;;  %s1223_s28 = smov %s1072_s11 }
 0x1cf   : > { %s1224_s29 = smov %s1061_s8  ;;  %21 = sbr.rel (!%p19_p2) target bundleno = 6 (0x6), region = 83 }
 0x1d4   :  { %809 = vsyncpa [#allocation4], 1 }
 0x1d5   :  { %811 = vsyncpa [#allocation4 + $0x1], 1 }

</bundles_post_ra>
